<compile_context>
chip_gen: v5e
topology: v5e:2x2
jax: 0.10.0
libtpu: 0.0.40
codegen_flags: <defaults>
</compile_context>

<pallas_src>
import functools

import jax
import jax.numpy as jnp
from jax import lax
from jax.experimental import pallas as pl
from jax.experimental.pallas import tpu as pltpu

_EPS = 1e-5


# --------------------------------------------------------------------------
# Hardware-aware sizing helpers
# --------------------------------------------------------------------------
def _round_up(a, m):
    return ((a + m - 1) // m) * m


def _sublane_multiple(dtype):
    itemsize = jnp.dtype(dtype).itemsize
    if itemsize >= 4:
        return 8
    if itemsize == 2:
        return 16
    return 32


def _vmem_capacity_bytes():
    """Physical VMEM per TensorCore; generation-aware with safe fallbacks."""
    try:
        cap = int(getattr(pltpu.get_tpu_info(), "vmem_capacity_bytes", 0))
        if cap > 0:
            return cap
    except Exception:
        pass
    try:
        kind = jax.devices()[0].device_kind.lower()
    except Exception:
        kind = ""
    if any(tag in kind for tag in ("v4", "v5", "v6")):
        return 128 << 20
    # Unknown / newer generation: assume v7x-class (64 MiB per TensorCore).
    return 64 << 20


def _budgets():
    """(target f32-footprint block bytes, vmem_limit clamp) per generation."""
    cap = _vmem_capacity_bytes()
    if cap >= (128 << 20):            # v5e / v6e: 128 MiB physical VMEM
        return 6 << 20, 96 << 20
    if cap >= (64 << 20):             # v7x: 64 MiB physical VMEM per TC
        return 4 << 20, 40 << 20
    return 2 << 20, max(8 << 20, (cap * 3) // 4)


def _choose_block_rows(n, chw_p, sub, target_block_bytes):
    """Samples per block.

    Budgeted on the f32 upcast footprint (dominates VMEM for bf16 inputs),
    rounded to the dtype's sublane multiple, and — when the batch allows an
    aligned split — capped so the 1-D grid keeps >= 2 steps, letting
    dimension_semantics=("parallel",) shard across v7x's 2 TensorCores.
    """
    per_row_f32 = max(1, chw_p * 4)
    bn = max(1, target_block_bytes // per_row_f32)
    if bn >= n:
        bn = n
        if n >= 2 * sub:
            half = _round_up(pl.cdiv(n, 2), sub)
            if half < n:
                bn = half
    else:
        bn = max(sub, (bn // sub) * sub)
    return min(bn, n)


# --------------------------------------------------------------------------
# Kernels
# --------------------------------------------------------------------------
def _gn1_fused_kernel(x_ref, w_ref, b_ref, o_ref, *, inv_count, epilogue,
                      low_precision):
    # x_ref: (bn, CHWp)   w_ref / b_ref: (1, CHWp)   o_ref: (bn, CHWp)
    x = x_ref[...].astype(jnp.float32)

    # Single sweep: per-row sums then scalar 1/CHW scale (true CHW, so zero
    # padding of the lane axis does not bias the statistics).
    s = jnp.sum(x, axis=-1, keepdims=True)
    s2 = jnp.sum(x * x, axis=-1, keepdims=True)
    mean = s * inv_count
    var = s2 * inv_count - mean * mean          # biased, matches PyTorch
    inv = lax.rsqrt(var + _EPS)

    if low_precision:
        # bf16 affine + fused fn: halves VALU work/elem on v6e/v7x; padded
        # lanes have w == b == 0 so they stay finite (zero).
        cdt = o_ref.dtype
        y = ((x - mean) * inv).astype(cdt) * w_ref[...].astype(cdt) \
            + b_ref[...].astype(cdt)
    else:
        y = (x - mean) * inv * w_ref[...].astype(jnp.float32) \
            + b_ref[...].astype(jnp.float32)
    o_ref[...] = epilogue(y).astype(o_ref.dtype)


def _gn1_stats_kernel(x_ref, mean_ref, rstd_ref, sum_sc, sq_sc, *, inv_count):
    # Two-pass path, pass 1: accumulate per-sample sum / sum_sq over CHW tiles.
    k = pl.program_id(1)

    @pl.when(k == 0)
    def _():
        sum_sc[...] = jnp.zeros_like(sum_sc)
        sq_sc[...] = jnp.zeros_like(sq_sc)

    x = x_ref[...].astype(jnp.float32)
    sum_sc[...] += jnp.sum(x, axis=-1, keepdims=True)
    sq_sc[...] += jnp.sum(x * x, axis=-1, keepdims=True)

    @pl.when(k == pl.num_programs(1) - 1)
    def _():
        mean = sum_sc[...] * inv_count
        var = sq_sc[...] * inv_count - mean * mean
        mean_ref[...] = mean
        rstd_ref[...] = lax.rsqrt(var + _EPS)


def _gn1_apply_kernel(x_ref, mean_ref, rstd_ref, w_ref, b_ref, o_ref, *,
                      epilogue, low_precision):
    # Two-pass path, pass 2: normalize + affine + fused elementwise fn.
    x = x_ref[...].astype(jnp.float32)
    xn = (x - mean_ref[...]) * rstd_ref[...]
    if low_precision:
        cdt = o_ref.dtype
        y = xn.astype(cdt) * w_ref[...].astype(cdt) + b_ref[...].astype(cdt)
    else:
        y = xn * w_ref[...].astype(jnp.float32) + b_ref[...].astype(jnp.float32)
    o_ref[...] = epilogue(y).astype(o_ref.dtype)


# --------------------------------------------------------------------------
# Wrappers
# --------------------------------------------------------------------------
def groupnorm1(x_nchw, weight, bias, epilogue_fn=None, *,
               force_two_pass=False, tile_cols=None):
    """GroupNorm(num_groups=1, num_channels=C) on NCHW input via Pallas, with
    an optional fused elementwise epilogue."""
    N, C, H, W = x_nchw.shape
    HW = H * W
    CHW = C * HW
    dtype = x_nchw.dtype
    itemsize = jnp.dtype(dtype).itemsize
    sub = _sublane_multiple(dtype)
    target_block, vmem_clamp = _budgets()

    epilogue = epilogue_fn if epilogue_fn is not None else (lambda y: y)
    low_precision = jnp.dtype(dtype) == jnp.dtype(jnp.bfloat16)
    inv_count = 1.0 / float(CHW)

    x2 = x_nchw.reshape(N, CHW)
    # Per-channel affine pre-broadcast once (channel-major, matches reshape).
    w_full = jnp.repeat(weight.astype(dtype), HW)
    b_full = jnp.repeat(bias.astype(dtype), HW)

    min_rows = min(N, sub)
    two_pass = force_two_pass or (min_rows * _round_up(CHW, 128) * 4 > target_block)

    if not two_pass:
        # ----------------- single fused pass -----------------
        chw_p = _round_up(CHW, 128)          # lane-dense output, unmasked vst
        if chw_p != CHW:
            pad = chw_p - CHW
            x2 = jnp.pad(x2, ((0, 0), (0, pad)))
            w_full = jnp.pad(w_full, (0, pad))
            b_full = jnp.pad(b_full, (0, pad))
        w2 = w_full.reshape(1, chw_p)
        b2 = b_full.reshape(1, chw_p)

        bn = _choose_block_rows(N, chw_p, sub, target_block)
        grid = (pl.cdiv(N, bn),)

        # VMEM budget: in+out double-buffered + ~3x f32 temporaries + affine.
        io_block = bn * chw_p * itemsize
        temp_f32 = 3 * bn * chw_p * 4
        wb_bytes = 2 * chw_p * itemsize
        vmem_limit = int(min(vmem_clamp,
                             max(16 << 20,
                                 4 * io_block + temp_f32 + 4 * wb_bytes + (4 << 20))))

        cost = pl.CostEstimate(
            flops=10 * N * chw_p,
            transcendentals=N * chw_p,
            bytes_accessed=2 * N * chw_p * itemsize + 2 * chw_p * itemsize,
        )

        kernel = functools.partial(_gn1_fused_kernel, inv_count=inv_count,
                                   epilogue=epilogue, low_precision=low_precision)
        out = pl.pallas_call(
            kernel,
            out_shape=jax.ShapeDtypeStruct((N, chw_p), dtype),
            grid_spec=pltpu.PrefetchScalarGridSpec(
                num_scalar_prefetch=0,
                grid=grid,
                in_specs=[
                    pl.BlockSpec((bn, chw_p), lambda i: (i, 0)),
                    pl.BlockSpec((1, chw_p), lambda i: (0, 0)),
                    pl.BlockSpec((1, chw_p), lambda i: (0, 0)),
                ],
                out_specs=pl.BlockSpec((bn, chw_p), lambda i: (i, 0)),
            ),
            compiler_params=pltpu.CompilerParams(
                dimension_semantics=("parallel",),
                vmem_limit_bytes=vmem_limit,
            ),
            cost_estimate=cost,
        )(x2, w2, b2)
        if chw_p != CHW:
            out = out[:, :CHW]
        return out.reshape(N, C, H, W)

    # ----------------- two-pass tiled path (large C*H*W rows) -----------------
    bn = min(N, sub)
    if tile_cols is not None:
        tc = _round_up(int(tile_cols), 128)
    else:
        tc = (target_block // (bn * 4)) // 128 * 128
        tc = max(128, min(tc, _round_up(CHW, 128)))
    chw_p = _round_up(CHW, tc)               # full tiles only: keeps sums exact
    if chw_p != CHW:
        pad = chw_p - CHW
        x2 = jnp.pad(x2, ((0, 0), (0, pad)))
        w_full = jnp.pad(w_full, (0, pad))
        b_full = jnp.pad(b_full, (0, pad))
    w2 = w_full.reshape(1, chw_p)
    b2 = b_full.reshape(1, chw_p)

    nb = pl.cdiv(N, bn)
    kc = chw_p // tc
    grid = (nb, kc)

    io_block = bn * tc * itemsize
    temp_f32 = 3 * bn * tc * 4
    vmem_limit = int(min(vmem_clamp,
                         max(16 << 20,
                             8 * io_block + temp_f32 + 4 * tc * itemsize + (4 << 20))))

    # Pass 1: per-sample mean / rstd via accumulator scratch + finalize.
    stats_cost = pl.CostEstimate(
        flops=3 * N * chw_p,
        transcendentals=N,
        bytes_accessed=N * chw_p * itemsize + 8 * N,
    )
    mean, rstd = pl.pallas_call(
        functools.partial(_gn1_stats_kernel, inv_count=inv_count),
        out_shape=(jax.ShapeDtypeStruct((N, 1), jnp.float32),
                   jax.ShapeDtypeStruct((N, 1), jnp.float32)),
        grid_spec=pltpu.PrefetchScalarGridSpec(
            num_scalar_prefetch=0,
            grid=grid,
            in_specs=[pl.BlockSpec((bn, tc), lambda i, k: (i, k))],
            out_specs=(pl.BlockSpec((bn, 1), lambda i, k: (i, 0)),
                       pl.BlockSpec((bn, 1), lambda i, k: (i, 0))),
            scratch_shapes=[pltpu.VMEM((bn, 1), jnp.float32),
                            pltpu.VMEM((bn, 1), jnp.float32)],
        ),
        compiler_params=pltpu.CompilerParams(
            dimension_semantics=("parallel", "arbitrary"),
            vmem_limit_bytes=vmem_limit,
        ),
        cost_estimate=stats_cost,
    )(x2)

    # Pass 2: normalize + affine + fused epilogue, tile by tile.
    apply_cost = pl.CostEstimate(
        flops=8 * N * chw_p,
        transcendentals=N * chw_p,
        bytes_accessed=2 * N * chw_p * itemsize + 2 * chw_p * itemsize + 8 * N,
    )
    out = pl.pallas_call(
        functools.partial(_gn1_apply_kernel, epilogue=epilogue,
                          low_precision=low_precision),
        out_shape=jax.ShapeDtypeStruct((N, chw_p), dtype),
        grid_spec=pltpu.PrefetchScalarGridSpec(
            num_scalar_prefetch=0,
            grid=grid,
            in_specs=[
                pl.BlockSpec((bn, tc), lambda i, k: (i, k)),
                pl.BlockSpec((bn, 1), lambda i, k: (i, 0)),
                pl.BlockSpec((bn, 1), lambda i, k: (i, 0)),
                pl.BlockSpec((1, tc), lambda i, k: (0, k)),
                pl.BlockSpec((1, tc), lambda i, k: (0, k)),
            ],
            out_specs=pl.BlockSpec((bn, tc), lambda i, k: (i, k)),
        ),
        compiler_params=pltpu.CompilerParams(
            dimension_semantics=("parallel", "parallel"),
            vmem_limit_bytes=vmem_limit,
        ),
        cost_estimate=apply_cost,
    )(x2, mean, rstd, w2, b2)
    if chw_p != CHW:
        out = out[:, :CHW]
    return out.reshape(N, C, H, W)


def pre_norm(x_nchw, weight, bias, fn, fn_is_elementwise=False):
    """PreNorm.forward: x = GroupNorm(1, dim)(x); return fn(x).

    If fn is elementwise it is fused into the kernel epilogue (single HBM
    pass); otherwise it is applied as plain JAX afterwards.
    """
    # TODO(synk): non-elementwise `fn` (e.g. attention / conv blocks) is left
    # to XLA after the norm; only elementwise fns are fused into the kernel.
    if fn_is_elementwise:
        return groupnorm1(x_nchw, weight, bias, epilogue_fn=fn)
    return fn(groupnorm1(x_nchw, weight, bias))


def _reference(x, weight, bias):
    # Pure-JAX reference for GroupNorm(1, C) on NCHW.
    xf = x.astype(jnp.float32)
    mean = jnp.mean(xf, axis=(1, 2, 3), keepdims=True)
    var = jnp.mean(jnp.square(xf - mean), axis=(1, 2, 3), keepdims=True)
    xn = (xf - mean) * lax.rsqrt(var + _EPS)
    return (xn * weight.reshape(1, -1, 1, 1) + bias.reshape(1, -1, 1, 1)).astype(x.dtype)


if __name__ == "__main__":
    key = jax.random.PRNGKey(0)
    kx, kw, kb = jax.random.split(key, 3)

    N, C, H, W = 2, 4, 16, 16
    x = jax.random.normal(kx, (N, C, H, W), dtype=jnp.float32)
    weight = 1.0 + 0.1 * jax.random.normal(kw, (C,), dtype=jnp.float32)
    bias = 0.1 * jax.random.normal(kb, (C,), dtype=jnp.float32)

    # PreNorm's fn is arbitrary; here an elementwise fn -> fused. approximate
    # (tanh) gelu lands the transcendental on the EUP slot.
    fn = functools.partial(jax.nn.gelu, approximate=True)
    ref = fn(_reference(x, weight, bias))

    # 1) fused single-pass path.
    out = jax.block_until_ready(pre_norm(x, weight, bias, fn, fn_is_elementwise=True))
    assert out.shape == (N, C, H, W)
    assert jnp.max(jnp.abs(out - ref)) < 5e-5

    # 2) tiled two-pass path (auto-selected for large C*H*W rows); forced here
    #    with 128-wide tiles to exercise the accumulator / finalize logic.
    out2 = jax.block_until_ready(
        groupnorm1(x, weight, bias, epilogue_fn=fn, force_two_pass=True, tile_cols=128))
    assert jnp.max(jnp.abs(out2 - ref)) < 5e-5

    # 3) bf16 input -> low-precision affine + gelu epilogue (v6e/v7x VALU saver).
    xb = x.astype(jnp.bfloat16)
    outb = jax.block_until_ready(pre_norm(xb, weight, bias, fn, fn_is_elementwise=True))
    refb = fn(_reference(xb, weight, bias)).astype(jnp.float32)
    assert jnp.max(jnp.abs(outb.astype(jnp.float32) - refb)) < 1e-1

    print("KERNEL_OK")
</pallas_src>

<mosaic_0001>
module attributes {stable_mosaic.version = 11 : i64} {
  func.func @_gn1_fused_kernel(%arg0: i32, %arg1: memref<2x1024xf32, #tpu.memory_space<vmem>>, %arg2: memref<1x1024xf32, #tpu.memory_space<vmem>>, %arg3: memref<1x1024xf32, #tpu.memory_space<vmem>>, %arg4: memref<2x1024xf32, #tpu.memory_space<vmem>>) attributes {dimension_semantics = [#tpu.dimension_semantics<parallel>], iteration_bounds = array<i64: 1>, scalar_prefetch = 0 : i64, scratch_operands = 0 : i64, tpu.core_type = #tpu.core_type<tc>, window_params = [{transform_indices = @transform_0, window_bounds = array<i64: 2, 1024>}, {pipeline_mode = #tpu.pipeline_mode<synchronous>, transform_indices = @transform_1, window_bounds = array<i64: 1, 1024>}, {pipeline_mode = #tpu.pipeline_mode<synchronous>, transform_indices = @transform_2, window_bounds = array<i64: 1, 1024>}, {transform_indices = @transform_3, window_bounds = array<i64: 2, 1024>}]} {
    %c0 = arith.constant 0 : index
    %c0_0 = arith.constant 0 : index
    %0 = vector.load %arg1[%c0, %c0_0] : memref<2x1024xf32, #tpu.memory_space<vmem>>, vector<2x1024xf32>
    %cst = arith.constant dense<0.000000e+00> : vector<2xf32>
    %1 = vector.multi_reduction <add>, %0, %cst [1] : vector<2x1024xf32> to vector<2xf32>
    %2 = vector.shape_cast %1 : vector<2xf32> to vector<2x1xf32>
    %3 = arith.mulf %0, %0 : vector<2x1024xf32>
    %cst_1 = arith.constant dense<0.000000e+00> : vector<2xf32>
    %4 = vector.multi_reduction <add>, %3, %cst_1 [1] : vector<2x1024xf32> to vector<2xf32>
    %5 = vector.shape_cast %4 : vector<2xf32> to vector<2x1xf32>
    %cst_2 = arith.constant 9.765625E-4 : f32
    %6 = vector.broadcast %cst_2 : f32 to vector<2x1xf32>
    %7 = arith.mulf %2, %6 : vector<2x1xf32>
    %cst_3 = arith.constant 9.765625E-4 : f32
    %8 = vector.broadcast %cst_3 : f32 to vector<2x1xf32>
    %9 = arith.mulf %5, %8 : vector<2x1xf32>
    %10 = arith.mulf %7, %7 : vector<2x1xf32>
    %11 = arith.subf %9, %10 : vector<2x1xf32>
    %cst_4 = arith.constant 9.99999974E-6 : f32
    %12 = vector.broadcast %cst_4 : f32 to vector<2x1xf32>
    %13 = arith.addf %11, %12 : vector<2x1xf32>
    %14 = math.rsqrt %13 : vector<2x1xf32>
    %15 = vector.broadcast %7 : vector<2x1xf32> to vector<2x1024xf32>
    %16 = arith.subf %0, %15 : vector<2x1024xf32>
    %17 = vector.broadcast %14 : vector<2x1xf32> to vector<2x1024xf32>
    %18 = arith.mulf %16, %17 : vector<2x1024xf32>
    %c0_5 = arith.constant 0 : index
    %c0_6 = arith.constant 0 : index
    %19 = vector.load %arg2[%c0_5, %c0_6] : memref<1x1024xf32, #tpu.memory_space<vmem>>, vector<1x1024xf32>
    %20 = vector.broadcast %19 : vector<1x1024xf32> to vector<2x1024xf32>
    %21 = arith.mulf %18, %20 : vector<2x1024xf32>
    %c0_7 = arith.constant 0 : index
    %c0_8 = arith.constant 0 : index
    %22 = vector.load %arg3[%c0_7, %c0_8] : memref<1x1024xf32, #tpu.memory_space<vmem>>, vector<1x1024xf32>
    %23 = vector.broadcast %22 : vector<1x1024xf32> to vector<2x1024xf32>
    %24 = arith.addf %21, %23 : vector<2x1024xf32>
    %25 = arith.mulf %24, %24 : vector<2x1024xf32>
    %26 = arith.mulf %24, %25 : vector<2x1024xf32>
    %cst_9 = arith.constant 4.471500e-02 : f32
    %27 = vector.broadcast %cst_9 : f32 to vector<2x1024xf32>
    %28 = arith.mulf %27, %26 : vector<2x1024xf32>
    %29 = arith.addf %24, %28 : vector<2x1024xf32>
    %cst_10 = arith.constant 0.797884583 : f32
    %30 = vector.broadcast %cst_10 : f32 to vector<2x1024xf32>
    %31 = arith.mulf %30, %29 : vector<2x1024xf32>
    %32 = math.tanh %31 : vector<2x1024xf32>
    %cst_11 = arith.constant 1.000000e+00 : f32
    %33 = vector.broadcast %cst_11 : f32 to vector<2x1024xf32>
    %34 = arith.addf %33, %32 : vector<2x1024xf32>
    %cst_12 = arith.constant 5.000000e-01 : f32
    %35 = vector.broadcast %cst_12 : f32 to vector<2x1024xf32>
    %36 = arith.mulf %35, %34 : vector<2x1024xf32>
    %37 = arith.mulf %24, %36 : vector<2x1024xf32>
    %c0_13 = arith.constant 0 : index
    %c0_14 = arith.constant 0 : index
    %38 = vector.load %arg4[%c0_13, %c0_14] : memref<2x1024xf32, #tpu.memory_space<vmem>>, vector<2x1024xf32>
    tpu.vector_store %arg4[%c0_13, %c0_14], %37 {strides = array<i32>} : memref<2x1024xf32, #tpu.memory_space<vmem>>, vector<2x1024xf32>,
    return
  }
  func.func @transform_0(%arg0: i32) -> (i32, i32) {
    %c0_i32 = arith.constant 0 : i32
    %c0_i32_0 = arith.constant 0 : i32
    return %arg0, %c0_i32 : i32, i32
  }
  func.func @transform_1(%arg0: i32) -> (i32, i32) {
    %c0_i32 = arith.constant 0 : i32
    %c0_i32_0 = arith.constant 0 : i32
    %c0_i32_1 = arith.constant 0 : i32
    return %c0_i32, %c0_i32_0 : i32, i32
  }
  func.func @transform_2(%arg0: i32) -> (i32, i32) {
    %c0_i32 = arith.constant 0 : i32
    %c0_i32_0 = arith.constant 0 : i32
    %c0_i32_1 = arith.constant 0 : i32
    return %c0_i32, %c0_i32_0 : i32, i32
  }
  func.func @transform_3(%arg0: i32) -> (i32, i32) {
    %c0_i32 = arith.constant 0 : i32
    %c0_i32_0 = arith.constant 0 : i32
    return %arg0, %c0_i32 : i32, i32
  }
}

</mosaic_0001>

<bundles_post_ra>
// kernel: tpu_custom_call.1
= control target key start
LH: loop header
LB: loop body
LE: loop exit
PB: predicated region body
PF: predicated region fallthrough
CT: control target
= control target key end

     0   :  { %8 = vsyncpa [#allocation3], 0  ;;  %s450_s0 = inlined_call_operand.hbm [shape: f32[2,1024], index: 0, kind: input, shape index: {}]   ;;  %s451_s1 = inlined_call_operand.hbm [shape: f32[1,1024], index: 1, kind: input, shape index: {}]   ;;  %s452_s2 = inlined_call_operand.hbm [shape: f32[1,1024], index: 2, kind: input, shape index: {}]   ;;  %s453_s3 = inlined_call_operand.hbm [shape: f32[2,1024], index: 3, kind: output, shape index: {}]  }
   0x1   :  { %9 = vsyncpa [#allocation6], 0  ;;  %s27_s14 = sshll.u32 %s451_s1, 4  ;;  %s28_s14 = int_to_ptr.hbm [resolvable:$true] %s27_s14 }
   0x2   :  { %10 = vsyncpa [#allocation4], 0  ;;  %s373_s15 = smov [#allocation5]   ;;  %s16_s19 = sshll.u32 %s450_s0, 4  ;;  %s17_s19 = int_to_ptr.hbm [resolvable:$true] %s16_s19 }
   0x3   :  { %s29_s16 = sshll.u32 %s373_s15, 4  ;;  %s374_s20 = smov [#allocation2]   ;;  %s30_s16 = int_to_ptr.vmem [resolvable:$true] %s29_s16 }
   0x4   :  { %32 = dma.hbm_to_vmem [thread:$0]  %s28_s14, 128, %s30_s16, [#allocation6]  }
   0x5   :  { %s18_s21 = sshll.u32 %s374_s20, 4  ;;  %s38_s24 = sshll.u32 %s452_s2, 4  ;;  %s19_s21 = int_to_ptr.vmem [resolvable:$true] %s18_s21  ;;  %s39_s24 = int_to_ptr.hbm [resolvable:$true] %s38_s24 }
   0x6   :  { %21 = dma.hbm_to_vmem [thread:$0]  %s17_s19, 256, %s19_s21, [#allocation3]  }
   0x7   :  { %s375_s1 = smov [#allocation7]  }
   0x8   :  { %s40_s25 = sshll.u32 %s375_s1, 4  ;;  %s41_s25 = int_to_ptr.vmem [resolvable:$true] %s40_s25 }
   0x9   :  { %43 = dma.hbm_to_vmem [thread:$0]  %s39_s24, 128, %s41_s25, [#allocation6]  }
   0xa   :  { %367 = dma.done.wait [#allocation3], 256  }
   0xb   :  { %368 = vsyncadd [#allocation3], 4294967040 }
   0xc   :  { %369 = dma.done.wait [#allocation6], 256  }
   0xd   :  { %370 = vsyncadd [#allocation6], 4294967040  ;;  %v407_v0 = vld [vmem:[#allocation2] sm:$0xff]  ;;  %v409_v1 = vld [vmem:[#allocation2 + $0x8] sm:$0xff]  ;;  %vm79_vm0 = vcmask 1041408   ;;  %vm185_vm1 = vcmask 1045508  }
   0xe   :  { %60 = vst [vmem:[#allocation1] ss:$4 sm:$0xff] %v407_v0  ;;  %v97_v4 = vmul.f32 %v407_v0, %v407_v0  ;;  %v98_v7 = vmul.f32 %v409_v1, %v409_v1  ;;  %v168_v57 = vld [vmem:[#allocation5] sm:$0xff]  ;;  %v376_v58 = vmov 269488144   ;;  %vm187_vm3 = vcmask 1043456  }
   0xf   :  { %62 = vst [vmem:[#allocation1 + $0x20] ss:$4 sm:$0xff] %v409_v1  ;;  %v154_v59 = vunpack.c.l.s4 %v376_v58  ;;  %v171_v60 = vperm.slane %v168_v57, 1  ;;  %v172_v61 = vperm.slane %v168_v57, 2  ;;  %s377_s0 = smov [#allocation8]   ;;  %s249_s28 = sshll.u32 %s453_s3, 4  ;;  %s250_s28 = int_to_ptr.hbm [resolvable:$true] %s249_s28 }
  0x10   :  { %s247_s2 = sshll.u32 %s377_s0, 4  ;;  %s248_s2 = int_to_ptr.vmem [resolvable:$true] %s247_s2 }
  0x11   :  { %v155_v63 = vunpack.c.0.s8 %v154_v59 }
  0x15   :  { %v63_v2 = vld.sshfl [vmem:[#allocation1] sm:$0xff pattern:$0x73625140]  ;;  %v64_v3 = vld.sshfl [vmem:[#allocation1 + $0x8] sm:$0xff pattern:$0x73625140] }
  0x16   :  { %v65_v5 = vld.sshfl [vmem:[#allocation1 + $0x10] sm:$0xff pattern:$0x73625140]  ;;  %v66_v6 = vld.sshfl [vmem:[#allocation1 + $0x18] sm:$0xff pattern:$0x73625140] }
  0x17   :  { %v67_v8 = vld.sshfl [vmem:[#allocation1 + $0x20] sm:$0xff pattern:$0x73625140]  ;;  %v68_v9 = vld.sshfl [vmem:[#allocation1 + $0x28] sm:$0xff pattern:$0x73625140] }
  0x18   :  { %v69_v10 = vld.sshfl [vmem:[#allocation1 + $0x30] sm:$0xff pattern:$0x73625140]  ;;  %v70_v11 = vld.sshfl [vmem:[#allocation1 + $0x38] sm:$0xff pattern:$0x73625140] }
  0x19   :  { %v80_v12 = vsel %vm79_vm0, %v63_v2, 0.0  ;;  %v81_v13 = vsel %vm79_vm0, %v64_v3, 0.0  ;;  %v83_v14 = vsel %vm79_vm0, %v65_v5, 0.0  ;;  %101 = vst [vmem:[#allocation1] ss:$4 sm:$0xff] %v97_v4  ;;  %v85_v16 = vsel %vm79_vm0, %v66_v6, 0.0 }
  0x1a   :  { %v82_v15 = vadd.f32 %v81_v13, %v80_v12  ;;  %103 = vst [vmem:[#allocation1 + $0x20] ss:$4 sm:$0xff] %v98_v7  ;;  %v87_v18 = vsel %vm79_vm0, %v67_v8, 0.0  ;;  %v89_v20 = vsel %vm79_vm0, %v68_v9, 0.0  ;;  %v91_v22 = vsel %vm79_vm0, %v69_v10, 0.0  ;;  %v196_v2 = vld [vmem:[#allocation7] sm:$0xff] }
  0x1b   :  { %v93_v27 = vsel %vm79_vm0, %v70_v11, 0.0  ;;  %v173_v3 = vperm.slane %v168_v57, 3  ;;  %v175_v4 = vperm.slane %v168_v57, 5  ;;  %v176_v5 = vperm.slane %v168_v57, 6 }
  0x1c   :  { %v84_v17 = vadd.f32 %v83_v14, %v82_v15  ;;  %v170_v7 = vperm.slane %v168_v57, 0  ;;  %v174_v8 = vperm.slane %v168_v57, 4  ;;  %v177_v9 = vperm.slane %v168_v57, 7 }
  0x1d   :  { %v178_v10 = vrot.slane %v171_v60, 6  ;;  %v179_v11 = vrot.slane %v172_v61, 4  ;;  %v199_v13 = vperm.slane %v196_v2, 1  ;;  %v200_v14 = vperm.slane %v196_v2, 2 }
  0x1e   :  { %v86_v19 = vadd.f32 %v85_v16, %v84_v17  ;;  %v201_v15 = vperm.slane %v196_v2, 3  ;;  %v203_v16 = vperm.slane %v196_v2, 5  ;;  %v204_v17 = vperm.slane %v196_v2, 6 }
  0x20   :  { %v88_v21 = vadd.f32 %v87_v18, %v86_v19  ;;  %v104_v23 = vld.sshfl [vmem:[#allocation1] sm:$0xff pattern:$0x73625140]  ;;  %v105_v24 = vld.sshfl [vmem:[#allocation1 + $0x8] sm:$0xff pattern:$0x73625140] }
  0x21   :  { %v106_v25 = vld.sshfl [vmem:[#allocation1 + $0x10] sm:$0xff pattern:$0x73625140]  ;;  %v107_v28 = vld.sshfl [vmem:[#allocation1 + $0x18] sm:$0xff pattern:$0x73625140] }
  0x22   :  { %v90_v26 = vadd.f32 %v89_v20, %v88_v21  ;;  %v120_v30 = vsel %vm79_vm0, %v104_v23, 0.0  ;;  %v121_v31 = vsel %vm79_vm0, %v105_v24, 0.0  ;;  %v123_v32 = vsel %vm79_vm0, %v106_v25, 0.0  ;;  %v108_v33 = vld.sshfl [vmem:[#allocation1 + $0x20] sm:$0xff pattern:$0x73625140] }
  0x23   :  { %v122_v34 = vadd.f32 %v121_v31, %v120_v30  ;;  %v125_v36 = vsel %vm79_vm0, %v107_v28, 0.0  ;;  %v109_v37 = vld.sshfl [vmem:[#allocation1 + $0x28] sm:$0xff pattern:$0x73625140]  ;;  %v127_v39 = vsel %vm79_vm0, %v108_v33, 0.0  ;;  %v205_v18 = vperm.slane %v196_v2, 7 }
  0x24   :  { %v92_v29 = vadd.f32 %v91_v22, %v90_v26  ;;  %v110_v40 = vld.sshfl [vmem:[#allocation1 + $0x30] sm:$0xff pattern:$0x73625140]  ;;  %v129_v42 = vsel %vm79_vm0, %v109_v37, 0.0  ;;  %v180_v19 = vrot.slane %v173_v3, 2  ;;  %v181_v20 = vrot.slane %v175_v4, 6 }
  0x25   :  { %v124_v38 = vadd.f32 %v123_v32, %v122_v34  ;;  %v111_v43 = vld.sshfl [vmem:[#allocation1 + $0x38] sm:$0xff pattern:$0x73625140]  ;;  %v131_v45 = vsel %vm79_vm0, %v110_v40, 0.0  ;;  %v182_v21 = vrot.slane %v176_v5, 4  ;;  %v183_v24 = vrot.slane %v177_v9, 2 }
  0x26   :  { %v94_v35 = vadd.f32 %v93_v27, %v92_v29  ;;  %v133_v47 = vsel %vm79_vm0, %v111_v43, 0.0  ;;  %v198_v25 = vperm.slane %v196_v2, 0  ;;  %v202_v26 = vperm.slane %v196_v2, 4 }
  0x27   :  { %v126_v41 = vadd.f32 %v125_v36, %v124_v38  ;;  %v206_v28 = vrot.slane %v199_v13, 6  ;;  %v207_v29 = vrot.slane %v200_v14, 4  ;;  %v208_v30 = vrot.slane %v201_v15, 2 }
  0x28   :  { %95 = vadd.xlane.f32.xlu0 %v94_v35  ;;  %v209_v31 = vrot.slane %v203_v16, 6  ;;  %v210_v32 = vrot.slane %v204_v17, 4  ;;  %v211_v33 = vrot.slane %v205_v18, 2  ;;  %v184_v35 = vsel %vm79_vm0, %v170_v7, %v178_v10 }
  0x29   :  { %v128_v44 = vadd.f32 %v127_v39, %v126_v41  ;;  %v186_v36 = vsel %vm185_vm1, %v179_v11, %v180_v19  ;;  %v189_v37 = vsel %vm79_vm0, %v174_v8, %v181_v20  ;;  %v190_v38 = vsel %vm185_vm1, %v182_v21, %v183_v24 }
  0x2b   :  { %v130_v46 = vadd.f32 %v129_v42, %v128_v44  ;;  %v212_v42 = vsel %vm79_vm0, %v198_v25, %v206_v28  ;;  %v213_v44 = vsel %vm185_vm1, %v207_v29, %v208_v30 }
  0x2d   :  { %v132_v48 = vadd.f32 %v131_v45, %v130_v46  ;;  %v215_v45 = vsel %vm79_vm0, %v202_v26, %v209_v31  ;;  %v216_v46 = vsel %vm185_vm1, %v210_v32, %v211_v33 }
  0x2f   :  { %v134_v49 = vadd.f32 %v133_v47, %v132_v48  ;;  %v188_v47 = vsel %vm187_vm3, %v184_v35, %v186_v36  ;;  %v191_v48 = vsel %vm187_vm3, %v189_v37, %v190_v38 }
  0x31   :  { %135 = vadd.xlane.f32.xlu0 %v134_v49 }
  0x9b   :  { %v96_v50 = vpop.xlane.xlu0 %95 }
  0x9c   :  { %v137_v51 = vmul.f32 0.0009765625, %v96_v50 }
  0x9e   :  { %v139_v53 = vmul.f32 %v137_v51, %v137_v51  ;;  %v156_v23 = vperm.slane %v137_v51, %v155_v63 }
  0xa0   :  { %v158_v39 = vsub.f32 %v407_v0, %v156_v23  ;;  %v159_v40 = vsub.f32 %v409_v1, %v156_v23  ;;  %v214_v0 = vsel %vm187_vm3, %v212_v42, %v213_v44  ;;  %v217_v1 = vsel %vm187_vm3, %v215_v45, %v216_v46 }
  0xa4   :  { %v136_v52 = vpop.xlane.xlu0 %135 }
  0xa5   :  { %v138_v54 = vmul.f32 0.0009765625, %v136_v52 }
  0xa7   :  { %v140_v55 = vsub.f32 %v138_v54, %v139_v53 }
  0xa9   :  { %v141_v56 = vadd.f32 1e-05, %v140_v55 }
  0xab   :  { %265 = vrsqrt.f32 %v141_v56  ;;  %vm148_vm4 = vweird.f32 %v141_v56 }
  0xb1   :  { %v266_v62 = vpop.eup %265 }
  0xb2   :  { %v143_v6 = vmul.f32 %v266_v62, %v141_v56  ;;  %vm149_vm2 = vweird.f32 %v266_v62 }
  0xb3   :  { %vm150_vm5 = vmor %vm148_vm4, %vm149_vm2 }
  0xb4   :  { %v144_v12 = vmul.f32 %v266_v62, %v143_v6 }
  0xb6   :  { %v145_v22 = vmul.f32 0.5, %v144_v12 }
  0xb8   :  { %v146_v27 = vsub.f32 1.5, %v145_v22 }
  0xba   :  { %v147_v34 = vmul.f32 %v266_v62, %v146_v27 }
  0xbc   :  { %v151_v41 = vsel %vm150_vm5, %v266_v62, %v147_v34 }
  0xbd   :  { %v164_v43 = vperm.slane %v151_v41, %v155_v63 }
  0xbf   :  { %v166_v49 = vmul.f32 %v164_v43, %v158_v39  ;;  %v167_v50 = vmul.f32 %v164_v43, %v159_v40 }
  0xc1   :  { %v194_v51 = vmul.f32 %v188_v47, %v166_v49  ;;  %v195_v52 = vmul.f32 %v191_v48, %v167_v50 }
  0xc3   :  { %v220_v53 = vadd.f32 %v214_v0, %v194_v51  ;;  %v221_v54 = vadd.f32 %v217_v1, %v195_v52 }
  0xc5   :  { %v222_v55 = vmul.f32 %v220_v53, %v220_v53  ;;  %v223_v56 = vmul.f32 %v221_v54, %v221_v54 }
  0xc7   :  { %v224_v57 = vmul.f32 %v222_v55, %v220_v53  ;;  %v225_v58 = vmul.f32 %v223_v56, %v221_v54 }
  0xc9   :  { %v226_v59 = vmul.f32 0.044715, %v224_v57  ;;  %v227_v60 = vmul.f32 0.044715, %v225_v58 }
  0xcb   :  { %v228_v61 = vadd.f32 %v226_v59, %v220_v53  ;;  %v229_v62 = vadd.f32 %v227_v60, %v221_v54 }
  0xcd   :  { %v230_v63 = vmul.f32 0.7978846, %v228_v61  ;;  %v231_v2 = vmul.f32 0.7978846, %v229_v62 }
  0xcf   :  { %267 = vtanh.f32 %v230_v63 }
  0xd0   :  { %269 = vtanh.f32 %v231_v2 }
  0xd5   :  { %v268_v3 = vpop.eup %267 }
  0xd6   :  { %v270_v4 = vpop.eup %269  ;;  %v234_v5 = vadd.f32 1.0, %v268_v3 }
  0xd7   :  { %v235_v6 = vadd.f32 1.0, %v270_v4 }
  0xd8   :  { %v236_v7 = vmul.f32 0.5, %v234_v5 }
  0xd9   :  { %v237_v8 = vmul.f32 0.5, %v235_v6 }
  0xda   :  { %v238_v9 = vmul.f32 %v236_v7, %v220_v53 }
  0xdb   :  { %v239_v10 = vmul.f32 %v237_v8, %v221_v54 }
  0xdc   :  { %240 = vst [vmem:[#allocation8] sm:$0xff] %v238_v9 }
  0xdd   :  { %241 = vst [vmem:[#allocation8 + $0x8] sm:$0xff] %v239_v10 }
  0xde   :  { %252 = dma.vmem_to_hbm [thread:$0]  %s248_s2, 256, %s250_s28, [#allocation4]  }
  0xdf   :  { %371 = dma.done.wait [#allocation4], 256  }
  0xe0   :  { %372 = vsyncadd [#allocation4], 4294967040 }
  0xe1   :  { %257 = vsyncpa [#allocation3], 1 }
  0xe2   :  { %258 = vsyncpa [#allocation6], 1 }
  0xe3   :  { %259 = vsyncpa [#allocation4], 1 }

</bundles_post_ra>
